<compile_context>
chip_gen: v5e
topology: v5e:2x2
jax: 0.10.0
libtpu: 0.0.40
codegen_flags: <defaults>
</compile_context>

<pallas_src>
import jax
import jax.numpy as jnp
from jax.experimental import pallas as pl
from jax.experimental.pallas import tpu as pltpu

NEG_SLOPE = 0.2  # LeakyReLU slope used by the synthetic blocks
_F32 = jnp.float32


# ----------------------------------------------------------------------------
# In-kernel helpers.  Activation layout: (N*L, C) -- positions on sublanes,
# channels on lanes, so every 1x1 conv is a single (M, Ci) @ (Ci, Co) matmul.
# ----------------------------------------------------------------------------
def _lrelu(v):
    return jnp.where(v >= 0.0, v, NEG_SLOPE * v)


def _conv1x1(v, w_ref, b_ref):
    w = w_ref[...]
    if w.shape[0] == 1:
        # Single input channel: the matmul degenerates to an outer product (VPU).
        y = v * w
    else:
        y = jnp.dot(v, w, preferred_element_type=_F32)
    return _lrelu(y + b_ref[...])


def _pool_pairs(scratch_ref, v):
    """AvgPool1d(2) on the position axis of an (N*L, C) value.

    Adjacent row pairs belong to the same batch element (L is even), so the
    pool is: stage the value in VMEM scratch, read even / odd rows back with a
    sublane-strided slice, average (one VPU add).  No O(L^2) pooling matmul and
    no (.., 2, C) tile-padded blocks; the conv chain runs only once per block.
    """
    m, c = v.shape
    scratch_ref[0:m, 0:c] = v
    ev = scratch_ref[pl.ds(0, m // 2, 2), pl.ds(0, c)]
    od = scratch_ref[pl.ds(1, m // 2, 2), pl.ds(0, c)]
    return 0.5 * (ev + od)


# ----------------------------------------------------------------------------
# Whole-forward fused kernel builder
# ----------------------------------------------------------------------------
def _build_forward_fn(blocks, cur_block, fading, N, C_in, L_in):
    """Builds (and jits) a function (x_ncl, alpha) -> output covering the whole
    ProgressiveDiscriminator.forward for a fixed structure (cur_block, fading,
    input shape).  alpha is a runtime value (SMEM scalar), so it never forces a
    recompile."""
    nb = len(blocks)
    M0 = N * L_in

    conv_params = []                      # (wT (Ci,Co), b (1,Co)) in kernel ref order

    def add_conv(wT, b2):
        conv_params.append((jnp.asarray(wT, _F32), jnp.asarray(b2, _F32)))
        return len(conv_params) - 1

    fade_conv_idx = None
    if fading:
        assert L_in % 2 == 0, "fade_sequence (AvgPool1d(2)) needs an even length"
        nxt = blocks[cur_block + 1]       # IndexError if cur_block is last (as in PyTorch)
        fade_conv_idx = add_conv(nxt.in_wT, nxt.in_b2)

    stages = []                           # ("mix"|"conv"|"pool"|"linear", arg)
    ch, length = C_in, L_in
    needs_pool = fading
    lin = None
    for i in range(cur_block, nb):
        blk = blocks[i]
        if fading and i == cur_block + 1:
            stages.append(("mix", None))
        if i == cur_block:
            stages.append(("conv", add_conv(blk.in_wT, blk.in_b2)))
            ch = blk.in_wT.shape[1]
        stages.append(("conv", add_conv(blk.mid_wT, blk.mid_b2)))
        ch = blk.mid_wT.shape[1]
        if blk.last:
            stages.append(("linear", None))
            lin = (blk, length, ch)
        else:
            assert length % 2 == 0, "AvgPool1d(2) needs an even length"
            stages.append(("pool", None))
            length //= 2
            needs_pool = True

    n_convs = len(conv_params)
    has_linear = lin is not None
    if has_linear:
        lblk, L_lin, C_lin = lin
        O = lblk.lin_w3.shape[0]
        assert lblk.lin_w3.shape == (O, L_lin, C_lin), (
            "Linear in_features do not match the activations entering the last block")
        # PyTorch flattens (C, L) c-major; lin_w3 is already permuted to (O, L, C).
        lwt = jnp.tile(lblk.lin_w3, (1, N, 1))                       # (O, N*L_lin, C_lin)
        sel = jnp.kron(jnp.eye(N, dtype=_F32),
                       jnp.ones((1, L_lin), _F32))                   # (N, N*L_lin) segment selector
        lb2 = lblk.lin_b2                                            # (1, O)
        out_shape = jax.ShapeDtypeStruct((N, O), _F32)
    else:
        out_shape = jax.ShapeDtypeStruct((N * length, ch), _F32)

    c_max = max([C_in] + [p[0].shape[1] for p in conv_params])

    def kernel(*refs):
        it = iter(refs)
        alpha_ref = next(it) if fading else None
        x_ref = next(it)
        conv_refs = [(next(it), next(it)) for _ in range(n_convs)]
        if has_linear:
            lwt_ref = next(it)
            sel_ref = next(it)
            lb_ref = next(it)
        out_ref = next(it)
        scratch_ref = next(it) if needs_pool else None

        x = x_ref[...]                                               # (N*L_in, C_in)
        a = None
        tmp = None
        if fading:
            a = alpha_ref[0]                                         # runtime alpha (SMEM)
            # fade path: AvgPool1d(2) of the raw input + blocks[cur+1].in_sequence
            wf, bf = conv_refs[fade_conv_idx]
            tmp = _conv1x1(_pool_pairs(scratch_ref, x), wf, bf)

        v = x
        for kind, arg in stages:
            if kind == "mix":                                        # alpha*x + (1-alpha)*tmp
                v = a * v + (1.0 - a) * tmp
            elif kind == "conv":                                     # 1x1 conv + LeakyReLU
                w_ref, b_ref = conv_refs[arg]
                v = _conv1x1(v, w_ref, b_ref)
            elif kind == "pool":                                     # AvgPool1d(2)
                v = _pool_pairs(scratch_ref, v)
            else:                                                    # flatten + Linear head
                cols = []
                for o in range(O):
                    z = v * lwt_ref[o]                               # (N*L_lin, C_lin)
                    s = jnp.dot(sel_ref[...], z,
                                preferred_element_type=_F32)         # (N, C_lin) per-batch sums
                    cols.append(jnp.sum(s, axis=-1, keepdims=True))  # (N, 1)
                v = (cols[0] if O == 1 else jnp.concatenate(cols, axis=-1)) + lb_ref[...]
        out_ref[...] = v

    vmem = pl.BlockSpec(memory_space=pltpu.MemorySpace.VMEM)
    smem = pl.BlockSpec(memory_space=pltpu.MemorySpace.SMEM)
    in_specs = ([smem] if fading else []) + \
        [vmem] * (1 + 2 * n_convs + (3 if has_linear else 0))
    scratch_shapes = [pltpu.VMEM((M0, c_max), _F32)] if needs_pool else []

    call = pl.pallas_call(
        kernel,
        out_shape=out_shape,
        in_specs=in_specs,
        out_specs=vmem,
        scratch_shapes=scratch_shapes,
    )

    final_len, final_ch = length, ch

    def fn(x_ncl, alpha):
        # NCL -> internal (N*L, C): positions on sublanes, channels on lanes.
        x2 = jnp.transpose(x_ncl, (0, 2, 1)).reshape(M0, C_in).astype(_F32)
        args = []
        if fading:
            args.append(jnp.asarray(alpha, _F32).reshape(1))
        args.append(x2)
        for wT, b2 in conv_params:
            args.extend((wT, b2))
        if has_linear:
            args.extend((lwt, sel, lb2))
        out = call(*args)
        if not has_linear:                 # (only hit if no block is `last`)
            out = jnp.transpose(out.reshape(N, final_len, final_ch), (0, 2, 1))
        return out

    return jax.jit(fn)


def _build_downsample_fn(N, C, L, k):
    """k successive fade_sequence AvgPool1d(2) steps as one fused kernel."""
    assert L % (1 << k) == 0
    M0 = N * L
    L_out = L >> k

    def kernel(x_ref, out_ref, scratch_ref):
        v = x_ref[...]
        for _ in range(k):
            v = _pool_pairs(scratch_ref, v)
        out_ref[...] = v

    vmem = pl.BlockSpec(memory_space=pltpu.MemorySpace.VMEM)
    call = pl.pallas_call(
        kernel,
        out_shape=jax.ShapeDtypeStruct((N * L_out, C), _F32),
        in_specs=[vmem],
        out_specs=vmem,
        scratch_shapes=[pltpu.VMEM((M0, C), _F32)],
    )

    def fn(x_ncl):
        x2 = jnp.transpose(x_ncl, (0, 2, 1)).reshape(M0, C).astype(_F32)
        y = call(x2)
        return jnp.transpose(y.reshape(N, L_out, C), (0, 2, 1))

    return jax.jit(fn)


# ----------------------------------------------------------------------------
# Synthetic ProgressiveDiscriminatorBlock + ProgressiveDiscriminator container
# ----------------------------------------------------------------------------
class ProgressiveDiscriminatorBlock:
    """Parameter holder for one progression stage.

    in_sequence  = Conv1d(*, C, 1) + LeakyReLU
    intermediate = Conv1d(C, C', 1) + LeakyReLU, then AvgPool1d(2) (non-last)
                   or flatten + Linear (last block)
    fade_sequence = AvgPool1d(2)

    Weight transposes, bias reshapes and the Linear-weight permutation are
    hoisted here (once, at init); the container fuses the whole forward.
    """

    def __init__(self, in_w, in_b, mid_w, mid_b, lin_w=None, lin_b=None,
                 last=False, lin_spatial=None):
        self.in_w = jnp.asarray(in_w, _F32)     # (Co, Ci)  PyTorch Conv1d k=1 layout
        self.in_b = jnp.asarray(in_b, _F32)     # (Co,)
        self.mid_w = jnp.asarray(mid_w, _F32)
        self.mid_b = jnp.asarray(mid_b, _F32)
        self.last = last
        self.lin_spatial = lin_spatial
        # hoisted layouts for the fused kernel
        self.in_wT = self.in_w.T                # (Ci, Co)
        self.in_b2 = self.in_b.reshape(1, -1)   # (1, Co)
        self.mid_wT = self.mid_w.T
        self.mid_b2 = self.mid_b.reshape(1, -1)
        if last:
            self.lin_w = jnp.asarray(lin_w, _F32)   # (C*L_f, O)
            self.lin_b = jnp.asarray(lin_b, _F32)   # (O,)
            Co = self.mid_wT.shape[1]
            O = self.lin_w.shape[1]
            assert lin_spatial is not None and self.lin_w.shape[0] == Co * lin_spatial
            # PyTorch flattens (C, L) c-major; permute the weight to (O, L, C).
            self.lin_w3 = (self.lin_w.reshape(Co, lin_spatial, O)
                           .transpose(2, 1, 0))
            self.lin_b2 = self.lin_b.reshape(1, O)


class ProgressiveDiscriminator:
    """Exact port of the PyTorch container's forward control flow.  The whole
    forward (fade path + all remaining blocks + final Linear) runs as a single
    fused Pallas kernel; alpha is passed at runtime so fading steps re-use one
    cached, jitted executable."""

    def __init__(self, blocks):
        self.blocks = list(blocks)
        self.cur_block = len(self.blocks) - 1
        self.alpha = 1.0
        self._fwd_cache = {}
        self._ds_cache = {}

    def forward(self, input):                  # input: (N, C, L) PyTorch NCL
        x = jnp.asarray(input, _F32)
        N, C_in, L_in = x.shape
        # Structural decision (same Python-float semantics as the PyTorch attribute);
        # the *value* of alpha is a runtime kernel input.
        fading = float(self.alpha) < 1.0
        key = (self.cur_block, fading, N, C_in, L_in)
        fn = self._fwd_cache.get(key)
        if fn is None:
            fn = _build_forward_fn(self.blocks, self.cur_block, fading, N, C_in, L_in)
            self._fwd_cache[key] = fn
        return fn(x, jnp.asarray(self.alpha, _F32))

    __call__ = forward

    def downsample_to_block(self, input, i_block):   # NCL in / NCL out
        if i_block <= 0:
            return input
        x = jnp.asarray(input, _F32)
        N, C, L = x.shape
        key = (i_block, N, C, L)
        fn = self._ds_cache.get(key)
        if fn is None:
            fn = _build_downsample_fn(N, C, L, i_block)
            self._ds_cache[key] = fn
        return fn(x)


# ----------------------------------------------------------------------------
# Pure-JAX reference (for correctness check), in PyTorch NCL layout
# ----------------------------------------------------------------------------
def _ref_conv(x, w, b):
    y = jnp.einsum("oc,ncl->nol", w, x) + b[None, :, None]
    return jnp.where(y >= 0.0, y, NEG_SLOPE * y)


def _ref_pool(x):
    N, C, L = x.shape
    return x.reshape(N, C, L // 2, 2).mean(-1)


def _ref_forward(x, blocks, cur_block, alpha):
    fade = False
    inp = x
    for i in range(cur_block, len(blocks)):
        blk = blocks[i]
        if alpha < 1.0 and i == cur_block:
            tmp = _ref_pool(inp)
            nxt = blocks[i + 1]
            tmp = _ref_conv(tmp, nxt.in_w, nxt.in_b)
            fade = True
        if fade and i == cur_block + 1:
            inp = alpha * inp + (1.0 - alpha) * tmp
        if i == cur_block:
            inp = _ref_conv(inp, blk.in_w, blk.in_b)
        y = _ref_conv(inp, blk.mid_w, blk.mid_b)
        if blk.last:
            y = y.reshape(y.shape[0], -1) @ blk.lin_w + blk.lin_b[None, :]
        else:
            y = _ref_pool(y)
        inp = y
    return inp


# ----------------------------------------------------------------------------
if __name__ == "__main__":
    # Keep the XLA-side reference matmuls at full f32 accuracy so they match
    # the in-kernel MXU f32 matmuls within tight tolerances.
    jax.config.update("jax_default_matmul_precision", "highest")

    key = jax.random.PRNGKey(0)
    ks = jax.random.split(key, 8)

    # Small deterministic shapes: batch=2, 1 input channel, signal length=16,
    # block channels C0=8, C1=16; 2 progression stages.
    N, L = 2, 16
    C0, C1 = 8, 16
    gain = (2.0 / (1.0 + NEG_SLOPE ** 2)) ** 0.5  # calculate_gain('leaky_relu', 0.2)

    def winit(k, co, ci):
        return gain * jax.random.normal(k, (co, ci), jnp.float32) / jnp.sqrt(ci)

    # Block 0: in 1->C0, mid C0->C1, AvgPool 16->8
    b0 = ProgressiveDiscriminatorBlock(
        in_w=winit(ks[0], C0, 1), in_b=0.01 * jnp.ones((C0,), jnp.float32),
        mid_w=winit(ks[1], C1, C0), mid_b=0.01 * jnp.ones((C1,), jnp.float32),
        last=False,
    )
    # Block 1 (last): in 1->C1, mid C1->C1, flatten (C1*8) -> Linear -> 1
    Lp = L // 2
    F = C1 * Lp
    b1 = ProgressiveDiscriminatorBlock(
        in_w=winit(ks[2], C1, 1), in_b=0.01 * jnp.ones((C1,), jnp.float32),
        mid_w=winit(ks[3], C1, C1), mid_b=0.01 * jnp.ones((C1,), jnp.float32),
        lin_w=jax.random.normal(ks[4], (F, 1), jnp.float32) / jnp.sqrt(F),
        lin_b=jnp.zeros((1,), jnp.float32),
        last=True, lin_spatial=Lp,
    )

    disc = ProgressiveDiscriminator([b0, b1])
    # Exercise the full progressive/fading path (attributes set externally,
    # exactly as done during progressive GAN training).
    disc.cur_block = 0
    disc.alpha = 0.5
    x = jax.random.normal(ks[5], (N, 1, L), jnp.float32)
    out = jax.block_until_ready(disc.forward(x))
    ref = _ref_forward(x, [b0, b1], cur_block=0, alpha=0.5)
    assert out.shape == (N, 1)
    assert jnp.allclose(out, ref, rtol=1e-4, atol=1e-4)

    # Change alpha: same cached executable (runtime SMEM scalar), new result.
    disc.alpha = 0.25
    out_b = jax.block_until_ready(disc.forward(x))
    ref_b = _ref_forward(x, [b0, b1], cur_block=0, alpha=0.25)
    assert jnp.allclose(out_b, ref_b, rtol=1e-4, atol=1e-4)

    # Default configuration (cur_block = last, alpha = 1.0, no fading).
    disc2 = ProgressiveDiscriminator([b0, b1])
    x2 = jax.random.normal(ks[6], (N, 1, L // 2), jnp.float32)
    out2 = jax.block_until_ready(disc2.forward(x2))
    ref2 = _ref_forward(x2, [b0, b1], cur_block=1, alpha=1.0)
    assert out2.shape == (N, 1)
    assert jnp.allclose(out2, ref2, rtol=1e-4, atol=1e-4)

    # downsample_to_block (chain of fade_sequence AvgPool1d(2) steps).
    ds = jax.block_until_ready(disc.downsample_to_block(x, 1))
    assert jnp.allclose(ds, _ref_pool(x), rtol=1e-5, atol=1e-5)

    print("KERNEL_OK")
</pallas_src>

<mosaic_0001>
module attributes {stable_mosaic.version = 11 : i64} {
  func.func @kernel(%arg0: memref<1xf32, #tpu.memory_space<smem>>, %arg1: memref<32x1xf32, #tpu.memory_space<vmem>>, %arg2: memref<1x16xf32, #tpu.memory_space<vmem>>, %arg3: memref<1x16xf32, #tpu.memory_space<vmem>>, %arg4: memref<1x8xf32, #tpu.memory_space<vmem>>, %arg5: memref<1x8xf32, #tpu.memory_space<vmem>>, %arg6: memref<8x16xf32, #tpu.memory_space<vmem>>, %arg7: memref<1x16xf32, #tpu.memory_space<vmem>>, %arg8: memref<16x16xf32, #tpu.memory_space<vmem>>, %arg9: memref<1x16xf32, #tpu.memory_space<vmem>>, %arg10: memref<1x16x16xf32, #tpu.memory_space<vmem>>, %arg11: memref<2x16xf32, #tpu.memory_space<vmem>>, %arg12: memref<1x1xf32, #tpu.memory_space<vmem>>, %arg13: memref<2x1xf32, #tpu.memory_space<vmem>>, %arg14: memref<32x16xf32, #tpu.memory_space<vmem>>) attributes {dimension_semantics = [], scalar_prefetch = 0 : i64, scratch_operands = 1 : i64, tpu.core_type = #tpu.core_type<tc>} {
    %c0 = arith.constant 0 : index
    %c0_0 = arith.constant 0 : index
    %0 = vector.load %arg1[%c0, %c0_0] : memref<32x1xf32, #tpu.memory_space<vmem>>, vector<32x1xf32>
    %c0_1 = arith.constant 0 : index
    %1 = memref.load %arg0[%c0_1] : memref<1xf32, #tpu.memory_space<smem>>
    %c0_2 = arith.constant 0 : index
    %c0_3 = arith.constant 0 : index
    %2 = vector.load %arg14[%c0_2, %c0_3] : memref<32x16xf32, #tpu.memory_space<vmem>>, vector<32x1xf32>
    tpu.vector_store %arg14[%c0_2, %c0_3], %0 {strides = array<i32>} : memref<32x16xf32, #tpu.memory_space<vmem>>, vector<32x1xf32>,
    %c0_4 = arith.constant 0 : index
    %c0_5 = arith.constant 0 : index
    %3 = tpu.strided_load %arg14[%c0_4, %c0_5] {strides = array<i32: 2, 1>} : memref<32x16xf32, #tpu.memory_space<vmem>>, vector<16x1xf32>
    %c1 = arith.constant 1 : index
    %c0_6 = arith.constant 0 : index
    %4 = tpu.strided_load %arg14[%c1, %c0_6] {strides = array<i32: 2, 1>} : memref<32x16xf32, #tpu.memory_space<vmem>>, vector<16x1xf32>
    %5 = arith.addf %3, %4 : vector<16x1xf32>
    %cst = arith.constant 5.000000e-01 : f32
    %6 = vector.broadcast %cst : f32 to vector<16x1xf32>
    %7 = arith.mulf %6, %5 : vector<16x1xf32>
    %c0_7 = arith.constant 0 : index
    %c0_8 = arith.constant 0 : index
    %8 = vector.load %arg2[%c0_7, %c0_8] : memref<1x16xf32, #tpu.memory_space<vmem>>, vector<1x16xf32>
    %9 = vector.broadcast %7 : vector<16x1xf32> to vector<16x16xf32>
    %10 = vector.broadcast %8 : vector<1x16xf32> to vector<16x16xf32>
    %11 = arith.mulf %9, %10 : vector<16x16xf32>
    %c0_9 = arith.constant 0 : index
    %c0_10 = arith.constant 0 : index
    %12 = vector.load %arg3[%c0_9, %c0_10] : memref<1x16xf32, #tpu.memory_space<vmem>>, vector<1x16xf32>
    %13 = vector.broadcast %12 : vector<1x16xf32> to vector<16x16xf32>
    %14 = arith.addf %11, %13 : vector<16x16xf32>
    %cst_11 = arith.constant 0.000000e+00 : f32
    %15 = vector.broadcast %cst_11 : f32 to vector<16x16xf32>
    %16 = arith.cmpf oge, %14, %15 : vector<16x16xf32>
    %cst_12 = arith.constant 2.000000e-01 : f32
    %17 = vector.broadcast %cst_12 : f32 to vector<16x16xf32>
    %18 = arith.mulf %17, %14 : vector<16x16xf32>
    %19 = arith.select %16, %14, %18 : vector<16x16xi1>, vector<16x16xf32>
    %c0_13 = arith.constant 0 : index
    %c0_14 = arith.constant 0 : index
    %20 = vector.load %arg4[%c0_13, %c0_14] : memref<1x8xf32, #tpu.memory_space<vmem>>, vector<1x8xf32>
    %21 = vector.broadcast %0 : vector<32x1xf32> to vector<32x8xf32>
    %22 = vector.broadcast %20 : vector<1x8xf32> to vector<32x8xf32>
    %23 = arith.mulf %21, %22 : vector<32x8xf32>
    %c0_15 = arith.constant 0 : index
    %c0_16 = arith.constant 0 : index
    %24 = vector.load %arg5[%c0_15, %c0_16] : memref<1x8xf32, #tpu.memory_space<vmem>>, vector<1x8xf32>
    %25 = vector.broadcast %24 : vector<1x8xf32> to vector<32x8xf32>
    %26 = arith.addf %23, %25 : vector<32x8xf32>
    %cst_17 = arith.constant 0.000000e+00 : f32
    %27 = vector.broadcast %cst_17 : f32 to vector<32x8xf32>
    %28 = arith.cmpf oge, %26, %27 : vector<32x8xf32>
    %cst_18 = arith.constant 2.000000e-01 : f32
    %29 = vector.broadcast %cst_18 : f32 to vector<32x8xf32>
    %30 = arith.mulf %29, %26 : vector<32x8xf32>
    %31 = arith.select %28, %26, %30 : vector<32x8xi1>, vector<32x8xf32>
    %c0_19 = arith.constant 0 : index
    %c0_20 = arith.constant 0 : index
    %32 = vector.load %arg6[%c0_19, %c0_20] : memref<8x16xf32, #tpu.memory_space<vmem>>, vector<8x16xf32>
    %cst_21 = arith.constant dense<0.000000e+00> : vector<32x16xf32>
    %33 = tpu.matmul %31, %32, %cst_21 {dimension_numbers = #tpu.dot_dimension_numbers<[1], [0], [0], [1], [0, 0, 1, 1], [], []>, precision = #tpu.contract_precision<fp32>} : vector<32x8xf32>, vector<8x16xf32>, vector<32x16xf32> -> vector<32x16xf32>
    %c0_22 = arith.constant 0 : index
    %c0_23 = arith.constant 0 : index
    %34 = vector.load %arg7[%c0_22, %c0_23] : memref<1x16xf32, #tpu.memory_space<vmem>>, vector<1x16xf32>
    %35 = vector.broadcast %34 : vector<1x16xf32> to vector<32x16xf32>
    %36 = arith.addf %33, %35 : vector<32x16xf32>
    %cst_24 = arith.constant 0.000000e+00 : f32
    %37 = vector.broadcast %cst_24 : f32 to vector<32x16xf32>
    %38 = arith.cmpf oge, %36, %37 : vector<32x16xf32>
    %cst_25 = arith.constant 2.000000e-01 : f32
    %39 = vector.broadcast %cst_25 : f32 to vector<32x16xf32>
    %40 = arith.mulf %39, %36 : vector<32x16xf32>
    %41 = arith.select %38, %36, %40 : vector<32x16xi1>, vector<32x16xf32>
    %c0_26 = arith.constant 0 : index
    %c0_27 = arith.constant 0 : index
    %42 = vector.load %arg14[%c0_26, %c0_27] : memref<32x16xf32, #tpu.memory_space<vmem>>, vector<32x16xf32>
    tpu.vector_store %arg14[%c0_26, %c0_27], %41 {strides = array<i32>} : memref<32x16xf32, #tpu.memory_space<vmem>>, vector<32x16xf32>,
    %c0_28 = arith.constant 0 : index
    %c0_29 = arith.constant 0 : index
    %43 = tpu.strided_load %arg14[%c0_28, %c0_29] {strides = array<i32: 2, 1>} : memref<32x16xf32, #tpu.memory_space<vmem>>, vector<16x16xf32>
    %c1_30 = arith.constant 1 : index
    %c0_31 = arith.constant 0 : index
    %44 = tpu.strided_load %arg14[%c1_30, %c0_31] {strides = array<i32: 2, 1>} : memref<32x16xf32, #tpu.memory_space<vmem>>, vector<16x16xf32>
    %45 = arith.addf %43, %44 : vector<16x16xf32>
    %cst_32 = arith.constant 5.000000e-01 : f32
    %46 = vector.broadcast %cst_32 : f32 to vector<16x16xf32>
    %47 = arith.mulf %46, %45 : vector<16x16xf32>
    %48 = vector.broadcast %1 : f32 to vector<16x16xf32>
    %49 = arith.mulf %48, %47 : vector<16x16xf32>
    %cst_33 = arith.constant 1.000000e+00 : f32
    %50 = arith.subf %cst_33, %1 : f32
    %51 = vector.broadcast %50 : f32 to vector<16x16xf32>
    %52 = arith.mulf %51, %19 : vector<16x16xf32>
    %53 = arith.addf %49, %52 : vector<16x16xf32>
    %c0_34 = arith.constant 0 : index
    %c0_35 = arith.constant 0 : index
    %54 = vector.load %arg8[%c0_34, %c0_35] : memref<16x16xf32, #tpu.memory_space<vmem>>, vector<16x16xf32>
    %cst_36 = arith.constant dense<0.000000e+00> : vector<16x16xf32>
    %55 = tpu.matmul %53, %54, %cst_36 {dimension_numbers = #tpu.dot_dimension_numbers<[1], [0], [0], [1], [0, 0, 1, 1], [], []>, precision = #tpu.contract_precision<fp32>} : vector<16x16xf32>, vector<16x16xf32>, vector<16x16xf32> -> vector<16x16xf32>
    %c0_37 = arith.constant 0 : index
    %c0_38 = arith.constant 0 : index
    %56 = vector.load %arg9[%c0_37, %c0_38] : memref<1x16xf32, #tpu.memory_space<vmem>>, vector<1x16xf32>
    %57 = vector.broadcast %56 : vector<1x16xf32> to vector<16x16xf32>
    %58 = arith.addf %55, %57 : vector<16x16xf32>
    %cst_39 = arith.constant 0.000000e+00 : f32
    %59 = vector.broadcast %cst_39 : f32 to vector<16x16xf32>
    %60 = arith.cmpf oge, %58, %59 : vector<16x16xf32>
    %cst_40 = arith.constant 2.000000e-01 : f32
    %61 = vector.broadcast %cst_40 : f32 to vector<16x16xf32>
    %62 = arith.mulf %61, %58 : vector<16x16xf32>
    %63 = arith.select %60, %58, %62 : vector<16x16xi1>, vector<16x16xf32>
    %c0_41 = arith.constant 0 : index
    %c0_42 = arith.constant 0 : index
    %c0_43 = arith.constant 0 : index
    %64 = vector.load %arg10[%c0_41, %c0_42, %c0_43] : memref<1x16x16xf32, #tpu.memory_space<vmem>>, vector<1x16x16xf32>
    %65 = vector.shape_cast %64 : vector<1x16x16xf32> to vector<16x16xf32>
    %66 = arith.mulf %63, %65 : vector<16x16xf32>
    %c0_44 = arith.constant 0 : index
    %c0_45 = arith.constant 0 : index
    %67 = vector.load %arg11[%c0_44, %c0_45] : memref<2x16xf32, #tpu.memory_space<vmem>>, vector<2x16xf32>
    %cst_46 = arith.constant dense<0.000000e+00> : vector<2x16xf32>
    %68 = tpu.matmul %67, %66, %cst_46 {dimension_numbers = #tpu.dot_dimension_numbers<[1], [0], [0], [1], [0, 0, 1, 1], [], []>, precision = #tpu.contract_precision<fp32>} : vector<2x16xf32>, vector<16x16xf32>, vector<2x16xf32> -> vector<2x16xf32>
    %cst_47 = arith.constant dense<0.000000e+00> : vector<2xf32>
    %69 = vector.multi_reduction <add>, %68, %cst_47 [1] : vector<2x16xf32> to vector<2xf32>
    %70 = vector.shape_cast %69 : vector<2xf32> to vector<2x1xf32>
    %c0_48 = arith.constant 0 : index
    %c0_49 = arith.constant 0 : index
    %71 = vector.load %arg12[%c0_48, %c0_49] : memref<1x1xf32, #tpu.memory_space<vmem>>, vector<1x1xf32>
    %72 = vector.broadcast %71 : vector<1x1xf32> to vector<2x1xf32>
    %73 = arith.addf %70, %72 : vector<2x1xf32>
    %c0_50 = arith.constant 0 : index
    %c0_51 = arith.constant 0 : index
    %74 = vector.load %arg13[%c0_50, %c0_51] : memref<2x1xf32, #tpu.memory_space<vmem>>, vector<2x1xf32>
    tpu.vector_store %arg13[%c0_50, %c0_51], %73 {strides = array<i32>} : memref<2x1xf32, #tpu.memory_space<vmem>>, vector<2x1xf32>,
    return
  }
}

</mosaic_0001>

<bundles_post_ra>
// kernel: fn.1
= control target key start
LH: loop header
LB: loop body
LE: loop exit
PB: predicated region body
PF: predicated region fallthrough
CT: control target
= control target key end

     0   :  { %vm52_vm0 = vcmask 7168   ;;  %v836_v0 = vmov 0   ;;  %vm149_vm1 = vcmask 64512   ;;  %vm413_vm7 = vcmask 130048   ;;  %s985_s1 = inlined_call_operand.vmem [shape: f32[32,1], index: 1, kind: input, shape index: {}]   ;;  %s986_s4 = inlined_call_operand.vmem [shape: f32[1,8], index: 4, kind: input, shape index: {}]   ;;  %s987_s5 = inlined_call_operand.vmem [shape: f32[1,8], index: 5, kind: input, shape index: {}]   ;;  %s988_s6 = inlined_call_operand.vmem [shape: f32[8,16], index: 6, kind: input, shape index: {}]   ;;  %s989_s7 = inlined_call_operand.vmem [shape: f32[1,16], index: 7, kind: input, shape index: {}, may-alias: {3,7,9}]   ;;  %s990_s2 = inlined_call_operand.vmem [shape: f32[1,16], index: 2, kind: input, shape index: {}]   ;;  %s991_s3 = inlined_call_operand.vmem [shape: f32[1,16], index: 3, kind: input, shape index: {}, may-alias: {3,7,9}]   ;;  %s992_s8 = inlined_call_operand.vmem [shape: f32[16,16], index: 8, kind: input, shape index: {}]   ;;  %s993_s0 = inlined_call_operand.<no memory space> [shape: f32[1], index: 0, kind: input, shape index: {}]   ;;  %s994_s9 = inlined_call_operand.vmem [shape: f32[1,16], index: 9, kind: input, shape index: {}, may-alias: {3,7,9}]   ;;  %s995_s11 = inlined_call_operand.vmem [shape: f32[2,16], index: 11, kind: input, shape index: {}]   ;;  %s996_s10 = inlined_call_operand.vmem [shape: f32[1,16,16], index: 10, kind: input, shape index: {}]   ;;  %s997_s12 = inlined_call_operand.<no memory space> [shape: f32[1,1], index: 12, kind: input, shape index: {}]   ;;  %s998_s13 = inlined_call_operand.vmem [shape: f32[2,1], index: 13, kind: output, shape index: {}]  }
   0x1   :  { %826 = vset.pattern.permute.xlu0 %v836_v0  ;;  %v47_v1 = vld [vmem:[%s985_s1] sm:$0xff]  ;;  %827 = vset.pattern.permute.xlu1 %v836_v0  ;;  %v49_v2 = vld [vmem:[%s985_s1 + $0x10] sm:$0xff]  ;;  %v48_v3 = vld [vmem:[%s985_s1 + $0x8] sm:$0xff]  ;;  %s429_s26 = ssub.f32 1.0, %s993_s0  ;;  %vm810_vm15 = vcmask 123904  }
   0x2   :  { %99 = vperm.xlu0 %826, %v47_v1   ;;  %53 = vst.msk [vmem:[#allocation2] sm:$0xff] %vm52_vm0, %v47_v1  ;;  %109 = vperm.xlu1 %827, %v49_v2   ;;  %v50_v4 = vld [vmem:[%s985_s1 + $0x18] sm:$0xff]  ;;  %v144_v5 = vld [vmem:[%s988_s6] sm:$0xff] }
   0x3   :  { %55 = vst.msk [vmem:[#allocation2 + $0x10] sm:$0xff] %vm52_vm0, %v49_v2  ;;  %828 = vset.pattern.permute.xlu2 %v836_v0  ;;  %v177_v6 = vand.u32 4294901760, %v144_v5  ;;  %v829_v11 = vld [vmem:[%s986_s4] ss:$0 sm:$0xff] }
   0x4   :  { %54 = vst.msk [vmem:[#allocation2 + $0x8] sm:$0xff] %vm52_vm0, %v48_v3  ;;  %v830_v12 = vld [vmem:[%s987_s5] ss:$0 sm:$0xff] }
   0x5   :  { %56 = vst.msk [vmem:[#allocation2 + $0x18] sm:$0xff] %vm52_vm0, %v50_v4  ;;  %v228_v7 = vsub.f32 %v144_v5, %v177_v6  ;;  %305 = vmatpush.msra.mxu3 %v177_v6  ;;  %178 = vmatpush.msra.mxu0 %v177_v6  ;;  %vm819_vm0 = vcmask 1024  }
   0x7   :  { %v229_v8 = vand.u32 4294901760, %v228_v7  ;;  %267 = vmatpush.msra.mxu2 %v228_v7 }
   0x9   :  { %v230_v9 = vsub.f32 %v228_v7, %v229_v8  ;;  %349 = vmatpush.msrb.mxu0 %v229_v8 }
   0xa   :  { %104 = vperm.xlu0 %826, %v48_v3   ;;  %114 = vperm.xlu1 %827, %v50_v4  }
   0xb   :  { %v231_v10 = vand.u32 4294901760, %v230_v9  ;;  %v57_v57 = vld [vmem:[#allocation2] ss:$2 sm:$0xff]  ;;  %v61_v58 = vld [vmem:[#allocation2 + $0x1] ss:$2 sm:$0xff] }
   0xc   :  { %v64_v59 = vadd.f32 %v61_v58, %v57_v57  ;;  %v59_v60 = vld [vmem:[#allocation2 + $0x10] ss:$2 sm:$0xff]  ;;  %v63_v61 = vld [vmem:[#allocation2 + $0x11] ss:$2 sm:$0xff] }
   0xd   :  { %232 = vmatpush.msra.mxu1 %v231_v10  ;;  %v65_v63 = vadd.f32 %v63_v61, %v59_v60 }
   0xe   :  { %v66_v62 = vmul.f32 0.5, %v64_v59 }
   0xf   :  { %383 = vmatpush.msrb.mxu1 %v177_v6  ;;  %v67_v0 = vmul.f32 0.5, %v65_v63  ;;  %v831_v6 = vld [vmem:[%s989_s7] ss:$0 sm:$0xff] }
  0x10   :  { %71 = vperm.xlu2 %828, %v66_v62  }
  0x18   :  { %76 = vperm.xlu2 %828, %v67_v0  }
  0x74   :  { %v100_v13 = vpop.permute.xlu0 %99  ;;  %v110_v14 = vpop.permute.xlu1 %109 }
  0x75   :  { %v120_v15 = vmul.f32 %v829_v11, %v100_v13  ;;  %v122_v16 = vmul.f32 %v829_v11, %v110_v14  ;;  %v435_v14 = vld [vmem:[%s992_s8] sm:$0xff] }
  0x77   :  { %v128_v17 = vadd.f32 %v830_v12, %v120_v15  ;;  %v130_v18 = vadd.f32 %v830_v12, %v122_v16 }
  0x79   :  { %vm132_vm2 = vcmp.ge.f32.partialorder %v128_v17, 0.0  ;;  %v136_v19 = vmul.f32 0.2, %v128_v17  ;;  %v138_v22 = vmul.f32 0.2, %v130_v18  ;;  %vm134_vm3 = vcmp.ge.f32.partialorder %v130_v18, 0.0 }
  0x7b   :  { %v140_v20 = vsel %vm132_vm2, %v128_v17, %v136_v19  ;;  %v142_v31 = vsel %vm134_vm3, %v130_v18, %v138_v22  ;;  %v463_v18 = vand.u32 4294901760, %v435_v14 }
  0x7c   :  { %v151_v21 = vsel %vm149_vm1, %v140_v20, 0  ;;  %v105_v23 = vpop.permute.xlu0 %104  ;;  %v115_v24 = vpop.permute.xlu1 %114  ;;  %v157_v34 = vsel %vm149_vm1, %v142_v31, 0 }
  0x7d   :  { %v121_v25 = vmul.f32 %v829_v11, %v105_v23  ;;  %v123_v26 = vmul.f32 %v829_v11, %v115_v24  ;;  %v179_v27 = vand.u32 4294901760, %v151_v21  ;;  %v195_v41 = vand.u32 4294901760, %v157_v34  ;;  %v436_v11 = vld [vmem:[%s992_s8 + $0x8] sm:$0xff] }
  0x7e   :  { %v503_v20 = vsub.f32 %v435_v14, %v463_v18 }
  0x7f   :  { %v129_v28 = vadd.f32 %v830_v12, %v121_v25  ;;  %v131_v29 = vadd.f32 %v830_v12, %v123_v26  ;;  %234 = vmatmul.f32.vlgmr.msra.gmra.mxu1 %v179_v27  ;;  %v180_v30 = vsub.f32 %v151_v21, %v179_v27  ;;  %v196_v45 = vsub.f32 %v157_v34, %v195_v41 }
  0x80   :  { %v461_v12 = vand.u32 4294901760, %v436_v11  ;;  %v504_v25 = vand.u32 4294901760, %v503_v20 }
  0x81   :  { %vm133_vm4 = vcmp.ge.f32.partialorder %v129_v28, 0.0  ;;  %v137_v32 = vmul.f32 0.2, %v129_v28  ;;  %270 = vmatmul.f32.vlgmr.msra.gmra.mxu2 %v180_v30  ;;  %v181_v33 = vand.u32 4294901760, %v180_v30  ;;  %v139_v37 = vmul.f32 0.2, %v131_v29 }
  0x82   :  { %vm135_vm5 = vcmp.ge.f32.partialorder %v131_v29, 0.0  ;;  %v197_v49 = vand.u32 4294901760, %v196_v45  ;;  %462 = vmatpush.msrb.mxu2 %v461_v12  ;;  %v497_v17 = vsub.f32 %v436_v11, %v461_v12  ;;  %625 = vmatpush.msra.mxu1 %v461_v12 }
  0x83   :  { %v141_v35 = vsel %vm133_vm4, %v129_v28, %v137_v32  ;;  %309 = vmatmul.f32.vlgmr.msra.gmra.mxu3 %v181_v33  ;;  %v182_v38 = vsub.f32 %v180_v30, %v181_v33  ;;  %v143_v43 = vsel %vm135_vm5, %v131_v29, %v139_v37  ;;  %v505_v28 = vsub.f32 %v503_v20, %v504_v25 }
  0x84   :  { %v154_v36 = vsel %vm149_vm1, %v141_v35, 0  ;;  %v160_v46 = vsel %vm149_vm1, %v143_v43, 0  ;;  %v198_v51 = vsub.f32 %v196_v45, %v197_v49  ;;  %v498_v19 = vand.u32 4294901760, %v497_v17  ;;  %627 = vmatpush.msra.mxu1 %v463_v18  ;;  %464 = vmatpush.msrb.mxu2 %v463_v18  ;;  %v832_v43 = vld [vmem:[%s990_s2] ss:$0 sm:$0xff] }
  0x85   :  { %v187_v39 = vand.u32 4294901760, %v154_v36  ;;  %v183_v40 = vand.u32 4294901760, %v182_v38  ;;  %v203_v50 = vand.u32 4294901760, %v160_v46  ;;  %v506_v32 = vand.u32 4294901760, %v505_v28 }
  0x86   :  { %v199_v53 = vand.u32 4294901760, %v198_v51  ;;  %533 = vmatpush.msra.mxu2 %v497_v17  ;;  %v499_v24 = vsub.f32 %v497_v17, %v498_v19  ;;  %v833_v51 = vld [vmem:[%s991_s3] ss:$0 sm:$0xff] }
  0x87   :  { %238 = vmatmul.f32.gmra.mxu1 %v187_v39  ;;  %v188_v42 = vsub.f32 %v154_v36, %v187_v39  ;;  %184 = vmatmul.f32.vlgmr.msra.gmra.mxu0 %v183_v40  ;;  %v204_v52 = vsub.f32 %v160_v46, %v203_v50 }
  0x88   :  { %596 = vmatpush.msra.mxu0 %v498_v19  ;;  %536 = vmatpush.msra.mxu2 %v503_v20 }
  0x89   :  { %275 = vmatmul.f32.gmra.mxu2 %v188_v42  ;;  %v189_v44 = vand.u32 4294901760, %v188_v42  ;;  %v205_v54 = vand.u32 4294901760, %v204_v52 }
  0x8a   :  { %600 = vmatpush.msra.mxu0 %v504_v25 }
  0x8b   :  { %v190_v47 = vsub.f32 %v188_v42, %v189_v44  ;;  %315 = vmatmul.f32.gmra.mxu3 %v189_v44  ;;  %v206_v55 = vsub.f32 %v204_v52, %v205_v54 }
  0x8d   :  { %v191_v48 = vand.u32 4294901760, %v190_v47  ;;  %v207_v56 = vand.u32 4294901760, %v206_v55  ;;  %v72_v47 = vpop.permute.xlu2 %71 }
  0x8f   :  { %242 = vmatmul.f32.gmra.mxu1 %v195_v41  ;;  %192 = vmatmul.f32.gmra.mxu0 %v191_v48 }
  0x91   :  { %280 = vmatmul.f32.gmra.mxu2 %v196_v45 }
  0x93   :  { %321 = vmatmul.f32.gmra.mxu3 %v197_v49 }
  0x95   :  { %v77_v17 = vpop.permute.xlu2 %76 }
  0x97   :  { %246 = vmatmul.f32.gmra.mxu1 %v203_v50  ;;  %200 = vmatmul.f32.gmra.mxu0 %v199_v53 }
  0x99   :  { %285 = vmatmul.f32.gmra.mxu2 %v204_v52  ;;  %v82_v52 = vmul.f32 %v832_v43, %v72_v47 }
  0x9b   :  { %327 = vmatmul.f32.gmra.mxu3 %v205_v54  ;;  %v88_v58 = vadd.f32 %v833_v51, %v82_v52 }
  0x9d   :  { %vm90_vm9 = vcmp.ge.f32.partialorder %v88_v58, 0.0 }
  0x9f   :  { %385 = vmatmul.f32.vlgmr.msrb.gmra.mxu1 %v179_v27  ;;  %208 = vmatmul.f32.gmra.mxu0 %v207_v56 }
  0xa7   :  { %389 = vmatmul.f32.gmra.mxu1 %v187_v39  ;;  %351 = vmatmul.f32.vlgmr.msrb.gmra.mxu0 %v179_v27  ;;  %v500_v27 = vand.u32 4294901760, %v499_v24 }
  0xa9   :  { %501 = vmatpush.msrb.mxu3 %v500_v27 }
  0xab   :  { %507 = vmatpush.msrb.mxu3 %v506_v32 }
  0xad   :  { %563 = vmatpush.msra.mxu3 %v461_v12  ;;  %v426_v12 = vstv %s993_s0 }
  0xaf   :  { %393 = vmatmul.f32.gmra.mxu1 %v195_v41  ;;  %355 = vmatmul.f32.gmra.mxu0 %v187_v39 }
  0xb0   :  { %565 = vmatpush.msra.mxu3 %v463_v18 }
  0xb7   :  { %397 = vmatmul.f32.gmra.mxu1 %v203_v50  ;;  %359 = vmatmul.f32.gmra.mxu0 %v195_v41 }
  0xbf   :  { %363 = vmatmul.f32.gmra.mxu0 %v203_v50 }
  0xfc   :  { %v235_v1 = vpop.f32.mrf.mxu1 }
 0x104   :  { %v239_v2 = vpop.f32.mrf.mxu1  ;;  %v185_v3 = vpop.f32.mrf.mxu0 }
 0x105   :  { %v186_v9 = vadd.f32 %v831_v6, %v185_v3  ;;  %v271_v10 = vpop.f32.mrf.mxu2 }
 0x106   :  { %v310_v15 = vpop.f32.mrf.mxu3 }
 0x107   :  { %v236_v13 = vadd.f32 %v235_v1, %v186_v9  ;;  %v92_v1 = vmul.f32 0.2, %v88_v58  ;;  %v430_v9 = vstv %s429_s26 }
 0x109   :  { %v272_v21 = vadd.f32 %v271_v10, %v236_v13 }
 0x10b   :  { %v311_v29 = vadd.f32 %v310_v15, %v272_v21  ;;  %v83_v21 = vmul.f32 %v832_v43, %v77_v17 }
 0x10c   :  { %v193_v4 = vpop.f32.mrf.mxu0  ;;  %v243_v5 = vpop.f32.mrf.mxu1 }
 0x10d   :  { %v194_v22 = vadd.f32 %v831_v6, %v193_v4  ;;  %v276_v26 = vpop.f32.mrf.mxu2  ;;  %v89_v25 = vadd.f32 %v833_v51, %v83_v21 }
 0x10e   :  { %v316_v34 = vpop.f32.mrf.mxu3 }
 0x10f   :  { %v240_v30 = vadd.f32 %v239_v2, %v194_v22  ;;  %v93_v28 = vmul.f32 0.2, %v89_v25  ;;  %vm91_vm12 = vcmp.ge.f32.partialorder %v89_v25, 0.0 }
 0x111   :  { %v277_v35 = vadd.f32 %v276_v26, %v240_v30 }
 0x113   :  { %v317_v40 = vadd.f32 %v316_v34, %v277_v35  ;;  %v95_v34 = vsel %vm91_vm12, %v89_v25, %v93_v28 }
 0x114   :  { %v201_v7 = vpop.f32.mrf.mxu0  ;;  %v939_v8 = vpop.f32.mrf.mxu1 }
 0x115   :  { %v202_v36 = vadd.f32 %v831_v6, %v201_v7  ;;  %v281_v44 = vpop.f32.mrf.mxu2 }
 0x116   :  { %v322_v53 = vpop.f32.mrf.mxu3 }
 0x117   :  { %v244_v41 = vadd.f32 %v243_v5, %v202_v36 }
 0x119   :  { %v282_v48 = vadd.f32 %v281_v44, %v244_v41 }
 0x11b   :  { %v323_v55 = vadd.f32 %v322_v53, %v282_v48 }
 0x11c   :  { %v209_v16 = vpop.f32.mrf.mxu0  ;;  %v386_v23 = vpop.f32.mrf.mxu1 }
 0x11d   :  { %v210_v49 = vadd.f32 %v831_v6, %v209_v16  ;;  %v286_v62 = vpop.f32.mrf.mxu2 }
 0x11e   :  { %v328_v3 = vpop.f32.mrf.mxu3 }
 0x11f   :  { %v248_v56 = vadd.f32 %v939_v8, %v210_v49  ;;  %v94_v8 = vsel %vm90_vm9, %v88_v58, %v92_v1  ;;  %v834_v49 = vld [vmem:[%s994_s9] ss:$0 sm:$0xff] }
 0x120   :  { %v431_v16 = vmul.f32 %v430_v9, %v94_v8 }
 0x121   :  { %v287_v63 = vadd.f32 %v286_v62, %v248_v56  ;;  %v647_v56 = vld [vmem:[%s995_s11] sm:$0x3] }
 0x123   :  { %v329_v4 = vadd.f32 %v328_v3, %v287_v63 }
 0x124   :  { %v352_v31 = vpop.f32.mrf.mxu0  ;;  %v390_v39 = vpop.f32.mrf.mxu1 }
 0x125   :  { %v353_v33 = vadd.f32 %v352_v31, %v311_v29 }
 0x127   :  { %v387_v37 = vadd.f32 %v386_v23, %v353_v33 }
 0x129   :  { %vm401_vm6 = vcmp.ge.f32.partialorder %v387_v37, 0.0  ;;  %v405_v38 = vmul.f32 0.2, %v387_v37 }
 0x12b   :  { %v409_v42 = vsel %vm401_vm6, %v387_v37, %v405_v38  ;;  %v432_v38 = vmul.f32 %v430_v9, %v95_v34 }
 0x12c   :  { %414 = vst.msk [vmem:[#allocation2] sm:$0xff] %vm413_vm7, %v409_v42  ;;  %v356_v45 = vpop.f32.mrf.mxu0  ;;  %v394_v59 = vpop.f32.mrf.mxu1 }
 0x12d   :  { %v357_v46 = vadd.f32 %v356_v45, %v317_v40 }
 0x12f   :  { %v391_v50 = vadd.f32 %v390_v39, %v357_v46 }
 0x131   :  { %vm402_vm8 = vcmp.ge.f32.partialorder %v391_v50, 0.0  ;;  %v406_v54 = vmul.f32 0.2, %v391_v50 }
 0x133   :  { %v410_v57 = vsel %vm402_vm8, %v391_v50, %v406_v54 }
 0x134   :  { %415 = vst.msk [vmem:[#allocation2 + $0x8] sm:$0xff] %vm413_vm7, %v410_v57  ;;  %v360_v60 = vpop.f32.mrf.mxu0  ;;  %v398_v14 = vpop.f32.mrf.mxu1 }
 0x135   :  { %v361_v61 = vadd.f32 %v360_v60, %v323_v55 }
 0x137   :  { %v395_v0 = vadd.f32 %v394_v59, %v361_v61  ;;  %v649_v61 = vsel %vm413_vm7, %v647_v56, 0 }
 0x139   :  { %vm403_vm10 = vcmp.ge.f32.partialorder %v395_v0, 0.0  ;;  %v407_v2 = vmul.f32 0.2, %v395_v0 }
 0x13b   :  { %v411_v5 = vsel %vm403_vm10, %v395_v0, %v407_v2  ;;  %v418_v6 = vld [vmem:[#allocation2] ss:$2 sm:$0xff]  ;;  %v420_v7 = vld [vmem:[#allocation2 + $0x1] ss:$2 sm:$0xff]  ;;  %v669_v2 = vand.u32 4294901760, %v649_v61 }
 0x13c   :  { %416 = vst.msk [vmem:[#allocation2 + $0x10] sm:$0xff] %vm413_vm7, %v411_v5  ;;  %v422_v10 = vadd.f32 %v420_v7, %v418_v6  ;;  %v364_v11 = vpop.f32.mrf.mxu0  ;;  %v643_v5 = vld [vmem:[%s996_s10] sm:$0xff] }
 0x13d   :  { %v365_v13 = vadd.f32 %v364_v11, %v329_v4  ;;  %v670_v11 = vsub.f32 %v649_v61, %v669_v2 }
 0x13e   :  { %v424_v15 = vmul.f32 0.5, %v422_v10 }
 0x13f   :  { %v399_v18 = vadd.f32 %v398_v14, %v365_v13 }
 0x140   :  { %v427_v19 = vmul.f32 %v426_v12, %v424_v15 }
 0x141   :  { %vm404_vm11 = vcmp.ge.f32.partialorder %v399_v18, 0.0  ;;  %v408_v20 = vmul.f32 0.2, %v399_v18 }
 0x142   :  { %v433_v22 = vadd.f32 %v431_v16, %v427_v19  ;;  %v671_v16 = vand.u32 4294901760, %v670_v11 }
 0x143   :  { %v412_v23 = vsel %vm404_vm11, %v399_v18, %v408_v20  ;;  %v644_v18 = vld [vmem:[%s996_s10 + $0x8] sm:$0xff] }
 0x144   :  { %417 = vst.msk [vmem:[#allocation2 + $0x18] sm:$0xff] %vm413_vm7, %v412_v23  ;;  %v442_v24 = vsel %vm413_vm7, %v433_v22, 0  ;;  %v672_v22 = vsub.f32 %v670_v11, %v671_v16 }
 0x145   :  { %v465_v26 = vand.u32 4294901760, %v442_v24 }
 0x147   :  { %509 = vmatmul.f32.vlgmr.msrb.gmra.mxu3 %v465_v26  ;;  %602 = vmatmul.f32.vlgmr.msra.gmra.mxu0 %v465_v26  ;;  %v466_v27 = vsub.f32 %v442_v24, %v465_v26 }
 0x148   :  { %629 = vmatmul.f32.vlgmr.msra.gmra.mxu1 %v465_v26  ;;  %v673_v26 = vand.u32 4294901760, %v672_v22 }
 0x149   :  { %v467_v29 = vand.u32 4294901760, %v466_v27 }
 0x14b   :  { %v419_v30 = vld [vmem:[#allocation2 + $0x10] ss:$2 sm:$0xff]  ;;  %v421_v31 = vld [vmem:[#allocation2 + $0x11] ss:$2 sm:$0xff]  ;;  %v468_v32 = vsub.f32 %v466_v27, %v467_v29 }
 0x14c   :  { %v423_v33 = vadd.f32 %v421_v31, %v419_v30 }
 0x14d   :  { %v469_v35 = vand.u32 4294901760, %v468_v32  ;;  %v19_v32 = vstv %s997_s12 }
 0x14e   :  { %v425_v36 = vmul.f32 0.5, %v423_v33  ;;  %20 = vst [vmem:[#allocation4] sm:$0x1] %v19_v32 }
 0x14f   :  { %470 = vmatmul.f32.vlgmr.msrb.gmra.mxu2 %v469_v35 }
 0x150   :  { %v428_v37 = vmul.f32 %v426_v12, %v425_v36 }
 0x152   :  { %v434_v39 = vadd.f32 %v432_v38, %v428_v37 }
 0x154   :  { %v445_v40 = vsel %vm413_vm7, %v434_v39, 0 }
 0x155   :  { %v473_v41 = vand.u32 4294901760, %v445_v40 }
 0x157   :  { %513 = vmatmul.f32.gmra.mxu3 %v473_v41  ;;  %606 = vmatmul.f32.gmra.mxu0 %v473_v41  ;;  %v474_v42 = vsub.f32 %v445_v40, %v473_v41 }
 0x158   :  { %633 = vmatmul.f32.gmra.mxu1 %v473_v41 }
 0x159   :  { %v475_v43 = vand.u32 4294901760, %v474_v42 }
 0x15b   :  { %v476_v44 = vsub.f32 %v474_v42, %v475_v43 }
 0x15d   :  { %v477_v45 = vand.u32 4294901760, %v476_v44 }
 0x15f   :  { %478 = vmatmul.f32.gmra.mxu2 %v477_v45  ;;  %569 = vmatmul.f32.vlgmr.msra.gmra.mxu3 %v467_v29  ;;  %v835_v45 = vld [vmem:[#allocation4] ss:$0 sm:$0xff] }
 0x167   :  { %539 = vmatmul.f32.vlgmr.msra.gmra.mxu2 %v466_v27  ;;  %575 = vmatmul.f32.gmra.mxu3 %v475_v43 }
 0x16f   :  { %544 = vmatmul.f32.gmra.mxu2 %v474_v42 }
 0x1c4   :  { %v603_v59 = vpop.f32.mrf.mxu0 }
 0x1c5   :  { %v630_v62 = vpop.f32.mrf.mxu1 }
 0x1ca   :  { %v510_v46 = vpop.f32.mrf.mxu3 }
 0x1d2   :  { %v471_v47 = vpop.f32.mrf.mxu2 }
 0x1d3   :  { %v472_v51 = vadd.f32 %v834_v49, %v471_v47 }
 0x1d4   :  { %v607_v9 = vpop.f32.mrf.mxu0 }
 0x1d5   :  { %v511_v52 = vadd.f32 %v510_v46, %v472_v51  ;;  %v634_v13 = vpop.f32.mrf.mxu1 }
 0x1da   :  { %v514_v48 = vpop.f32.mrf.mxu3 }
 0x1e2   :  { %v479_v50 = vpop.f32.mrf.mxu2  ;;  %v570_v53 = vpop.f32.mrf.mxu3 }
 0x1e3   :  { %v480_v57 = vadd.f32 %v834_v49, %v479_v50 }
 0x1e5   :  { %v515_v0 = vadd.f32 %v514_v48, %v480_v57 }
 0x1ea   :  { %v540_v54 = vpop.f32.mrf.mxu2  ;;  %v576_v6 = vpop.f32.mrf.mxu3 }
 0x1eb   :  { %v541_v55 = vadd.f32 %v540_v54, %v511_v52 }
 0x1ed   :  { %v571_v58 = vadd.f32 %v570_v53, %v541_v55 }
 0x1ef   :  { %v604_v60 = vadd.f32 %v603_v59, %v571_v58 }
 0x1f1   :  { %v631_v63 = vadd.f32 %v630_v62, %v604_v60 }
 0x1f2   :  { %v545_v1 = vpop.f32.mrf.mxu2 }
 0x1f3   :  { %vm637_vm13 = vcmp.ge.f32.partialorder %v631_v63, 0.0  ;;  %v639_v3 = vmul.f32 0.2, %v631_v63  ;;  %v546_v4 = vadd.f32 %v545_v1, %v515_v0 }
 0x1f5   :  { %v577_v7 = vadd.f32 %v576_v6, %v546_v4  ;;  %v641_v8 = vsel %vm637_vm13, %v631_v63, %v639_v3 }
 0x1f6   :  { %v645_v10 = vmul.f32 %v643_v5, %v641_v8 }
 0x1f7   :  { %v608_v12 = vadd.f32 %v607_v9, %v577_v7 }
 0x1f8   :  { %v667_v15 = vand.u32 4294901760, %v645_v10 }
 0x1f9   :  { %v635_v14 = vadd.f32 %v634_v13, %v608_v12 }
 0x1fa   :  { %v699_v21 = vsub.f32 %v645_v10, %v667_v15 }
 0x1fb   :  { %vm638_vm14 = vcmp.ge.f32.partialorder %v635_v14, 0.0  ;;  %v640_v17 = vmul.f32 0.2, %v635_v14 }
 0x1fc   :  { %v700_v25 = vand.u32 4294901760, %v699_v21 }
 0x1fd   :  { %v642_v19 = vsel %vm638_vm14, %v635_v14, %v640_v17 }
 0x1fe   :  { %v646_v20 = vmul.f32 %v644_v18, %v642_v19  ;;  %v701_v29 = vsub.f32 %v699_v21, %v700_v25 }
 0x200   :  { %v665_v23 = vand.u32 4294901760, %v646_v20  ;;  %v702_v31 = vand.u32 4294901760, %v701_v29 }
 0x202   :  { %666 = vmatpush.msrb.mxu2 %v665_v23  ;;  %802 = vmatpush.msrb.mxu1 %v665_v23  ;;  %v693_v24 = vsub.f32 %v646_v20, %v665_v23 }
 0x204   :  { %668 = vmatpush.msrb.mxu2 %v667_v15  ;;  %804 = vmatpush.msrb.mxu1 %v667_v15  ;;  %v694_v27 = vand.u32 4294901760, %v693_v24 }
 0x205   :  { %806 = vmatmul.f32.vlgmr.msrb.gmra.mxu1 %v669_v2  ;;  %674 = vmatmul.f32.vlgmr.msrb.gmra.mxu2 %v673_v26 }
 0x206   :  { %725 = vmatpush.msra.mxu2 %v693_v24  ;;  %777 = vmatpush.msrb.mxu0 %v694_v27  ;;  %v695_v28 = vsub.f32 %v693_v24, %v694_v27 }
 0x208   :  { %728 = vmatpush.msra.mxu2 %v699_v21  ;;  %781 = vmatpush.msrb.mxu0 %v700_v25  ;;  %v696_v30 = vand.u32 4294901760, %v695_v28 }
 0x209   :  { %783 = vmatmul.f32.vlgmr.msrb.gmra.mxu0 %v669_v2 }
 0x20a   :  { %697 = vmatpush.msrb.mxu3 %v696_v30 }
 0x20c   :  { %703 = vmatpush.msrb.mxu3 %v702_v31 }
 0x20d   :  { %705 = vmatmul.f32.vlgmr.msrb.gmra.mxu3 %v669_v2  ;;  %731 = vmatmul.f32.vlgmr.msra.gmra.mxu2 %v670_v11 }
 0x20e   :  { %750 = vmatpush.msra.mxu3 %v665_v23 }
 0x210   :  { %752 = vmatpush.msra.mxu3 %v667_v15 }
 0x215   :  { %756 = vmatmul.f32.vlgmr.msra.gmra.mxu3 %v671_v16 }
 0x282   :  { %v807_v41 = vpop.f32.mrf.mxu1 }
 0x286   :  { %v784_v39 = vpop.f32.mrf.mxu0 }
 0x288   :  { %v675_v33 = vpop.f32.mrf.mxu2 }
 0x290   :  { %v706_v34 = vpop.f32.mrf.mxu3  ;;  %v732_v36 = vpop.f32.mrf.mxu2 }
 0x291   :  { %v707_v35 = vadd.f32 %v706_v34, %v675_v33 }
 0x293   :  { %v733_v37 = vadd.f32 %v732_v36, %v707_v35 }
 0x298   :  { %v757_v38 = vpop.f32.mrf.mxu3 }
 0x299   :  { %v758_v40 = vadd.f32 %v757_v38, %v733_v37 }
 0x29b   :  { %v785_v42 = vadd.f32 %v784_v39, %v758_v40 }
 0x29d   :  { %v808_v43 = vadd.f32 %v807_v41, %v785_v42 }
 0x29f   :  { %v811_v44 = vsel %vm810_vm15, %v808_v43, 0.0 }
 0x2a0   :  { %812 = vadd.xlane.f32.xlu0 %v811_v44 }
 0x313   :  { %v813_v46 = vpop.xlane.xlu0 %812 }
 0x314   :  { %v818_v47 = vadd.f32 %v835_v45, %v813_v46 }
 0x316   :  { %820 = vst.msk [vmem:[%s998_s13] sm:$0x3] %vm819_vm0, %v818_v47 }

</bundles_post_ra>
